<compile_context>
chip_gen: v7x
topology: tpu7x:2x2x1
jax: 0.10.0
libtpu: 0.0.40
codegen_flags: <defaults>
</compile_context>

<pallas_src>
import functools
import math

import jax
import jax.numpy as jnp
from jax.experimental import pallas as pl
from jax.experimental.pallas import tpu as pltpu

_LANE = 128
_N_CORE_SPLITS = 2            # v7x has 2 TensorCores; harmless serial split on v5e/v6e
_TARGET_X_BYTES = 4 << 20     # ~4 MiB of x HBM traffic per grid step
_INPUT_VMEM_BUDGET = 24 << 20  # double-buffered input blocks (fits v7x 64 MiB VMEM)


def _ceil_to(v, m):
    return -(-v // m) * m


def _floor_to(v, m):
    return (v // m) * m


def _sublane_pad(rows, itemsize):
    # native sublane tiling: f32 -> 8, bf16/f16 -> 16, int8 -> 32
    t = max(8, 32 // int(itemsize))
    return _ceil_to(rows, t)


def _dice_partials_kernel(x_ref, y_ref, inter_ref, denom_ref, *,
                          label_targets: bool, hw: int, tile: int, sub: int,
                          steps_per_core: int, need_mask: bool):
    """Grid: (core_split [parallel], spatial step [arbitrary/reduction])."""
    core = pl.program_id(0)
    step = pl.program_id(1)
    B, C = x_ref.shape[0], x_ref.shape[1]
    n_sub = tile // sub

    @pl.when(step == 0)
    def _init():
        inter_ref[...] = jnp.zeros_like(inter_ref)
        denom_ref[...] = jnp.zeros_like(denom_ref)

    # constants hoisted out of the chunk loop (JAX does not CSE broadcasts)
    if label_targets:
        ch = jax.lax.broadcasted_iota(jnp.int32, (1, C, 1), 1)        # (1,C,1)
    if need_mask:
        lane = jax.lax.broadcasted_iota(jnp.int32, (1, 1, sub), 2)    # (1,1,sub)
        base = (core * steps_per_core + step) * tile                  # logical offset

    def chunk(j, carry):
        acc_i, acc_d = carry
        off = pl.multiple_of(j * sub, sub)
        x = x_ref[:, :, pl.ds(off, sub)].astype(jnp.float32)          # (B,C,sub)
        if need_mask:
            valid = (base + off + lane) < hw                          # (1,1,sub)
            x = jnp.where(valid, x, 0.0)
        if label_targets:
            lab = y_ref[:, :, pl.ds(off, sub)].astype(jnp.int32)      # (B,1,sub)
            onehot = lab == ch                                        # (B,C,sub)
            if need_mask:
                onehot = jnp.logical_and(onehot, valid)
            t = onehot.astype(jnp.float32)
            p_i = x * t
            p_d = x * x + t                                           # t*t == t
        else:
            t = y_ref[:, :, pl.ds(off, sub)].astype(jnp.float32)      # (B,C,sub)
            if need_mask:
                t = jnp.where(valid, t, 0.0)
            p_i = x * t
            p_d = x * x + t * t
        # fold the sub-lane chunk into 128-lane partials (pure VALU, no stores)
        for k in range(sub // _LANE):
            sl = slice(k * _LANE, (k + 1) * _LANE)
            acc_i = acc_i + p_i[:, :, sl]
            acc_d = acc_d + p_d[:, :, sl]
        return acc_i, acc_d

    zeros = jnp.zeros((B, C, _LANE), jnp.float32)
    if n_sub == 1:
        acc_i, acc_d = chunk(0, (zeros, zeros))
    else:
        acc_i, acc_d = jax.lax.fori_loop(0, n_sub, chunk, (zeros, zeros))

    # one tiny load/add/store of the VMEM-resident per-core output per step
    inter_ref[...] += acc_i
    denom_ref[...] += acc_d


@functools.partial(jax.jit, static_argnames=("batch_dice", "do_bg", "smooth"))
def _soft_dice_loss_squared_impl(x, y, *, batch_dice, do_bg, smooth):
    B, C = x.shape[0], x.shape[1]
    hw = int(math.prod(x.shape[2:]))

    # replicate the torch.no_grad() target-preparation block
    if y.ndim != x.ndim:
        y = y.reshape(y.shape[0], 1, *y.shape[1:])
    soft_targets = tuple(y.shape) == tuple(x.shape)

    x3 = x.reshape(B, C, hw)
    if soft_targets:
        y3 = y.reshape(B, C, hw)
        y_rows = C
    else:
        # stream labels narrow (int8 when possible): ~4x less label HBM traffic.
        # NOTE: labels outside [0, C) silently one-hot to all-zeros (PyTorch's
        # scatter_ would fault on them) — documented behavioral difference.
        lab_dtype = jnp.int8 if C <= 127 else jnp.int32
        y3 = y.reshape(B, 1, hw).astype(lab_dtype)
        y_rows = 1

    x_it = int(x3.dtype.itemsize)
    y_it = int(y3.dtype.itemsize)

    # inner lane-chunk size: bound vreg pressure (~6 live (rows, sub) f32
    # intermediates inside 64 x 1024-element vregs)
    rows_pad = B * _sublane_pad(C, 4)
    sub = _floor_to(max(_LANE, (64 * 1024) // (6 * rows_pad)), _LANE)
    sub = max(_LANE, min(sub, 2048))

    # DMA tile: big enough to amortise ~0.35 us/step, small enough that the
    # double-buffered input blocks stay inside the VMEM budget
    hbm_x_per_col = B * C * x_it
    vmem_per_col = 2 * (B * _sublane_pad(C, x_it) * x_it
                        + B * _sublane_pad(y_rows, y_it) * y_it)
    tile = min(_TARGET_X_BYTES // hbm_x_per_col, _INPUT_VMEM_BUDGET // vmem_per_col)
    tile = max(sub, _floor_to(int(tile), sub))
    tile = min(tile, _ceil_to(hw, sub))     # never larger than needed to cover hw
    n_tiles = -(-hw // tile)
    steps_per_core = -(-n_tiles // _N_CORE_SPLITS)
    need_mask = (_N_CORE_SPLITS * steps_per_core * tile) > hw

    # spatial block index, clamped so overshoot steps re-read the last valid
    # tile (their contribution is masked to zero in-kernel)
    def spatial_idx(i, s):
        return jnp.minimum(i * steps_per_core + s, n_tiles - 1)

    kernel = functools.partial(
        _dice_partials_kernel,
        label_targets=not soft_targets, hw=hw, tile=tile, sub=sub,
        steps_per_core=steps_per_core, need_mask=need_mask)

    part_shape = jax.ShapeDtypeStruct((_N_CORE_SPLITS * B, C, _LANE), jnp.float32)
    est_vmem = vmem_per_col * tile + 4 * B * _sublane_pad(C, 4) * _LANE * 4
    vmem_limit = int(min(48 << 20, max(32 << 20, est_vmem + (6 << 20))))

    # TODO(synk): for B*C >= 8, flatten (B, C) into the sublane dim ((B*C, hw)
    # layout) to fill vregs when C < 8; needs an in-kernel label row-repeat.
    inter_p, denom_p = pl.pallas_call(
        kernel,
        out_shape=(part_shape, part_shape),
        grid=(_N_CORE_SPLITS, steps_per_core),
        in_specs=[
            pl.BlockSpec((B, C, tile), lambda i, s: (0, 0, spatial_idx(i, s))),
            pl.BlockSpec((B, y_rows, tile), lambda i, s: (0, 0, spatial_idx(i, s))),
        ],
        out_specs=(
            pl.BlockSpec((B, C, _LANE), lambda i, s: (i, 0, 0)),
            pl.BlockSpec((B, C, _LANE), lambda i, s: (i, 0, 0)),
        ),
        compiler_params=pltpu.CompilerParams(
            dimension_semantics=("parallel", "arbitrary"),
            vmem_limit_bytes=vmem_limit,
        ),
    )(x3, y3)

    # tiny dice epilogue in plain JAX (negligible vs. the streamed reduction)
    intersect = inter_p.reshape(_N_CORE_SPLITS, B, C, _LANE).sum(axis=(0, 3))
    denominator = denom_p.reshape(_N_CORE_SPLITS, B, C, _LANE).sum(axis=(0, 3))
    if batch_dice:
        intersect = intersect.sum(axis=0)
        denominator = denominator.sum(axis=0)
    dc = 2.0 * (intersect + smooth) / (denominator + smooth)
    if not do_bg:
        dc = dc[1:] if batch_dice else dc[:, 1:]
    return 1.0 - jnp.mean(dc)


def soft_dice_loss_squared(x, y, loss_mask=None, *, apply_nonlin=None,
                           batch_dice=False, do_bg=True, smooth=1.0):
    """Pallas implementation of SoftDiceLossSquared.forward.

    x: (B, C, *spatial) logits/probs (any float dtype; cast to f32 in-kernel).
    y: same shape as x (soft / one-hot targets), or integer labels of shape
       (B, *spatial) or (B, 1, *spatial).
    loss_mask is accepted for API parity but (as in the reference) unused.
    """
    del loss_mask
    if apply_nonlin is not None:
        x = apply_nonlin(x)   # plain JAX op in the wrapper (module default: None)
    return _soft_dice_loss_squared_impl(
        x, y, batch_dice=bool(batch_dice), do_bg=bool(do_bg), smooth=float(smooth))


def _reference(x, y_onehot, *, batch_dice=False, do_bg=True, smooth=1.0):
    """Pure-JAX reference matching the PyTorch forward semantics."""
    if batch_dice:
        axes = tuple([0] + list(range(2, x.ndim)))
    else:
        axes = tuple(range(2, x.ndim))
    intersect = jnp.sum(x * y_onehot, axis=axes) + smooth
    denominator = jnp.sum(x * x + y_onehot * y_onehot, axis=axes) + smooth
    dc = 2.0 * intersect / denominator
    if not do_bg:
        dc = dc[1:] if batch_dice else dc[:, 1:]
    return 1.0 - jnp.mean(dc)


if __name__ == "__main__":
    key = jax.random.PRNGKey(0)
    kx, ky = jax.random.split(key)

    B, C, H, W = 2, 4, 16, 16
    # softmax-like probabilities (module default apply_nonlin=None uses x as-is)
    x = jax.nn.softmax(jax.random.normal(kx, (B, C, H, W), dtype=jnp.float32), axis=1)
    # integer segmentation labels -> exercises the scatter_ (one-hot) path
    y_lab = jax.random.randint(ky, (B, 1, H, W), 0, C, dtype=jnp.int32)

    ch = jnp.arange(C, dtype=jnp.int32).reshape(1, C, 1, 1)
    y_onehot = (y_lab == ch).astype(jnp.float32)

    checks = []
    # 1) integer-label path, default flags
    checks.append((soft_dice_loss_squared(x, y_lab), _reference(x, y_onehot)))
    # 2) labels without a channel dim (ndim-mismatch branch)
    checks.append((soft_dice_loss_squared(x, y_lab[:, 0]), _reference(x, y_onehot)))
    # 3) soft-target path (y already has the same shape as x)
    checks.append((soft_dice_loss_squared(x, y_onehot), _reference(x, y_onehot)))
    # 4) do_bg=False
    checks.append((soft_dice_loss_squared(x, y_lab, do_bg=False),
                   _reference(x, y_onehot, do_bg=False)))
    # 5) batch_dice=True
    checks.append((soft_dice_loss_squared(x, y_lab, batch_dice=True),
                   _reference(x, y_onehot, batch_dice=True)))
    # 6) bf16 transport with in-kernel f32 accumulation
    checks.append((soft_dice_loss_squared(x.astype(jnp.bfloat16), y_lab),
                   _reference(x.astype(jnp.bfloat16).astype(jnp.float32), y_onehot)))

    for got, want in checks:
        got = jax.block_until_ready(got)
        assert jnp.allclose(got, want, rtol=1e-5, atol=1e-5), (got, want)

    print("KERNEL_OK")
</pallas_src>

<mosaic_0001>
module attributes {stable_mosaic.version = 11 : i64} {
  func.func @_dice_partials_kernel(%arg0: i32, %arg1: i32, %arg2: memref<2x4x640xf32, #tpu.memory_space<vmem>>, %arg3: memref<2x1x640xi8, #tpu.memory_space<vmem>>, %arg4: memref<2x4x128xf32, #tpu.memory_space<vmem>>, %arg5: memref<2x4x128xf32, #tpu.memory_space<vmem>>) attributes {dimension_semantics = [#tpu.dimension_semantics<parallel>, #tpu.dimension_semantics<arbitrary>], iteration_bounds = array<i64: 2, 1>, scalar_prefetch = 0 : i64, scratch_operands = 0 : i64, tpu.core_type = #tpu.core_type<tc>, window_params = [{transform_indices = @transform_0, window_bounds = array<i64: 2, 4, 640>}, {transform_indices = @transform_1, window_bounds = array<i64: 2, 1, 640>}, {transform_indices = @transform_2, window_bounds = array<i64: 2, 4, 128>}, {transform_indices = @transform_3, window_bounds = array<i64: 2, 4, 128>}]} {
    %c0_i32 = arith.constant 0 : i32
    %0 = arith.cmpi eq, %arg1, %c0_i32 : i32
    %1 = arith.extui %0 : i1 to i32
    %c0_i32_0 = arith.constant 0 : i32
    %2 = arith.cmpi ne, %1, %c0_i32_0 : i32
    scf.if %2 {
      %cst_18 = arith.constant 0.000000e+00 : f32
      %60 = vector.broadcast %cst_18 : f32 to vector<2x4x128xf32>
      %c0_19 = arith.constant 0 : index
      %c0_20 = arith.constant 0 : index
      %c0_21 = arith.constant 0 : index
      %61 = vector.load %arg4[%c0_19, %c0_20, %c0_21] : memref<2x4x128xf32, #tpu.memory_space<vmem>>, vector<2x4x128xf32>
      tpu.vector_store %arg4[%c0_19, %c0_20, %c0_21], %60 {strides = array<i32>} : memref<2x4x128xf32, #tpu.memory_space<vmem>>, vector<2x4x128xf32>,
      %cst_22 = arith.constant 0.000000e+00 : f32
      %62 = vector.broadcast %cst_22 : f32 to vector<2x4x128xf32>
      %c0_23 = arith.constant 0 : index
      %c0_24 = arith.constant 0 : index
      %c0_25 = arith.constant 0 : index
      %63 = vector.load %arg5[%c0_23, %c0_24, %c0_25] : memref<2x4x128xf32, #tpu.memory_space<vmem>>, vector<2x4x128xf32>
      tpu.vector_store %arg5[%c0_23, %c0_24, %c0_25], %62 {strides = array<i32>} : memref<2x4x128xf32, #tpu.memory_space<vmem>>, vector<2x4x128xf32>,
    } else {
    }
    %3 = tpu.iota {dimensions = array<i32: 1>} : vector<1x4x1xi32>
    %4 = tpu.iota {dimensions = array<i32: 2>} : vector<1x1x640xi32>
    %c1_i32 = arith.constant 1 : i32
    %5 = arith.muli %arg0, %c1_i32 : i32
    %6 = arith.addi %5, %arg1 : i32
    %c640_i32 = arith.constant 640 : i32
    %7 = arith.muli %6, %c640_i32 : i32
    %cst = arith.constant 0.000000e+00 : f32
    %8 = vector.broadcast %cst : f32 to vector<2x4x128xf32>
    %c0_i32_1 = arith.constant 0 : i32
    %9 = tpu.assume_multiple %c0_i32_1, 640 : i32
    %c0 = arith.constant 0 : index
    %c0_2 = arith.constant 0 : index
    %10 = arith.index_cast %9 : i32 to index
    %11 = vector.load %arg2[%c0, %c0_2, %10] : memref<2x4x640xf32, #tpu.memory_space<vmem>>, vector<2x4x640xf32>
    %12 = arith.addi %7, %9 : i32
    %13 = vector.broadcast %12 : i32 to vector<1x1x640xi32>
    %14 = arith.addi %13, %4 : vector<1x1x640xi32>
    %c256_i32 = arith.constant 256 : i32
    %15 = vector.broadcast %c256_i32 : i32 to vector<1x1x640xi32>
    %16 = arith.cmpi slt, %14, %15 : vector<1x1x640xi32>
    %cst_3 = arith.constant 0.000000e+00 : f32
    %17 = vector.shape_cast %16 : vector<1x1x640xi1> to vector<1x1x640xi1>
    %18 = vector.broadcast %17 : vector<1x1x640xi1> to vector<2x4x640xi1>
    %19 = vector.broadcast %cst_3 : f32 to vector<2x4x640xf32>
    %20 = arith.select %18, %11, %19 : vector<2x4x640xi1>, vector<2x4x640xf32>
    %c0_4 = arith.constant 0 : index
    %c0_5 = arith.constant 0 : index
    %21 = arith.index_cast %9 : i32 to index
    %22 = vector.load %arg3[%c0_4, %c0_5, %21] : memref<2x1x640xi8, #tpu.memory_space<vmem>>, vector<2x1x640xi8>
    %23 = arith.extsi %22 : vector<2x1x640xi8> to vector<2x1x640xi32>
    %24 = vector.broadcast %23 : vector<2x1x640xi32> to vector<2x4x640xi32>
    %25 = vector.broadcast %3 : vector<1x4x1xi32> to vector<2x4x640xi32>
    %26 = arith.cmpi eq, %24, %25 : vector<2x4x640xi32>
    %27 = vector.broadcast %16 : vector<1x1x640xi1> to vector<2x4x640xi1>
    %28 = arith.andi %26, %27 : vector<2x4x640xi1>
    %29 = arith.extui %28 : vector<2x4x640xi1> to vector<2x4x640xi32>
    %30 = arith.sitofp %29 : vector<2x4x640xi32> to vector<2x4x640xf32>
    %31 = arith.mulf %20, %30 : vector<2x4x640xf32>
    %32 = arith.mulf %20, %20 : vector<2x4x640xf32>
    %33 = arith.addf %32, %30 : vector<2x4x640xf32>
    %34 = vector.extract_strided_slice %31 {offsets = [0, 0, 0], sizes = [2, 4, 128], strides = [1, 1, 1]} : vector<2x4x640xf32> to vector<2x4x128xf32>
    %35 = arith.addf %8, %34 : vector<2x4x128xf32>
    %36 = vector.extract_strided_slice %33 {offsets = [0, 0, 0], sizes = [2, 4, 128], strides = [1, 1, 1]} : vector<2x4x640xf32> to vector<2x4x128xf32>
    %37 = arith.addf %8, %36 : vector<2x4x128xf32>
    %38 = vector.extract_strided_slice %31 {offsets = [0, 0, 128], sizes = [2, 4, 128], strides = [1, 1, 1]} : vector<2x4x640xf32> to vector<2x4x128xf32>
    %39 = arith.addf %35, %38 : vector<2x4x128xf32>
    %40 = vector.extract_strided_slice %33 {offsets = [0, 0, 128], sizes = [2, 4, 128], strides = [1, 1, 1]} : vector<2x4x640xf32> to vector<2x4x128xf32>
    %41 = arith.addf %37, %40 : vector<2x4x128xf32>
    %42 = vector.extract_strided_slice %31 {offsets = [0, 0, 256], sizes = [2, 4, 128], strides = [1, 1, 1]} : vector<2x4x640xf32> to vector<2x4x128xf32>
    %43 = arith.addf %39, %42 : vector<2x4x128xf32>
    %44 = vector.extract_strided_slice %33 {offsets = [0, 0, 256], sizes = [2, 4, 128], strides = [1, 1, 1]} : vector<2x4x640xf32> to vector<2x4x128xf32>
    %45 = arith.addf %41, %44 : vector<2x4x128xf32>
    %46 = vector.extract_strided_slice %31 {offsets = [0, 0, 384], sizes = [2, 4, 128], strides = [1, 1, 1]} : vector<2x4x640xf32> to vector<2x4x128xf32>
    %47 = arith.addf %43, %46 : vector<2x4x128xf32>
    %48 = vector.extract_strided_slice %33 {offsets = [0, 0, 384], sizes = [2, 4, 128], strides = [1, 1, 1]} : vector<2x4x640xf32> to vector<2x4x128xf32>
    %49 = arith.addf %45, %48 : vector<2x4x128xf32>
    %50 = vector.extract_strided_slice %31 {offsets = [0, 0, 512], sizes = [2, 4, 128], strides = [1, 1, 1]} : vector<2x4x640xf32> to vector<2x4x128xf32>
    %51 = arith.addf %47, %50 : vector<2x4x128xf32>
    %52 = vector.extract_strided_slice %33 {offsets = [0, 0, 512], sizes = [2, 4, 128], strides = [1, 1, 1]} : vector<2x4x640xf32> to vector<2x4x128xf32>
    %53 = arith.addf %49, %52 : vector<2x4x128xf32>
    %c0_6 = arith.constant 0 : index
    %c0_7 = arith.constant 0 : index
    %c0_8 = arith.constant 0 : index
    %54 = vector.load %arg4[%c0_6, %c0_7, %c0_8] : memref<2x4x128xf32, #tpu.memory_space<vmem>>, vector<2x4x128xf32>
    %55 = arith.addf %54, %51 : vector<2x4x128xf32>
    %c0_9 = arith.constant 0 : index
    %c0_10 = arith.constant 0 : index
    %c0_11 = arith.constant 0 : index
    %56 = vector.load %arg4[%c0_9, %c0_10, %c0_11] : memref<2x4x128xf32, #tpu.memory_space<vmem>>, vector<2x4x128xf32>
    tpu.vector_store %arg4[%c0_9, %c0_10, %c0_11], %55 {strides = array<i32>} : memref<2x4x128xf32, #tpu.memory_space<vmem>>, vector<2x4x128xf32>,
    %c0_12 = arith.constant 0 : index
    %c0_13 = arith.constant 0 : index
    %c0_14 = arith.constant 0 : index
    %57 = vector.load %arg5[%c0_12, %c0_13, %c0_14] : memref<2x4x128xf32, #tpu.memory_space<vmem>>, vector<2x4x128xf32>
    %58 = arith.addf %57, %53 : vector<2x4x128xf32>
    %c0_15 = arith.constant 0 : index
    %c0_16 = arith.constant 0 : index
    %c0_17 = arith.constant 0 : index
    %59 = vector.load %arg5[%c0_15, %c0_16, %c0_17] : memref<2x4x128xf32, #tpu.memory_space<vmem>>, vector<2x4x128xf32>
    tpu.vector_store %arg5[%c0_15, %c0_16, %c0_17], %58 {strides = array<i32>} : memref<2x4x128xf32, #tpu.memory_space<vmem>>, vector<2x4x128xf32>,
    return
  }
  func.func @transform_0(%arg0: i32, %arg1: i32) -> (i32, i32, i32) {
    %c1_i32 = arith.constant 1 : i32
    %0 = arith.muli %arg0, %c1_i32 : i32
    %1 = arith.addi %0, %arg1 : i32
    %c0_i32 = arith.constant 0 : i32
    %2 = arith.minsi %1, %c0_i32 : i32
    %c0_i32_0 = arith.constant 0 : i32
    %c0_i32_1 = arith.constant 0 : i32
    %c0_i32_2 = arith.constant 0 : i32
    return %c0_i32_0, %c0_i32_1, %2 : i32, i32, i32
  }
  func.func @transform_1(%arg0: i32, %arg1: i32) -> (i32, i32, i32) {
    %c1_i32 = arith.constant 1 : i32
    %0 = arith.muli %arg0, %c1_i32 : i32
    %1 = arith.addi %0, %arg1 : i32
    %c0_i32 = arith.constant 0 : i32
    %2 = arith.minsi %1, %c0_i32 : i32
    %c0_i32_0 = arith.constant 0 : i32
    %c0_i32_1 = arith.constant 0 : i32
    %c0_i32_2 = arith.constant 0 : i32
    return %c0_i32_0, %c0_i32_1, %2 : i32, i32, i32
  }
  func.func @transform_2(%arg0: i32, %arg1: i32) -> (i32, i32, i32) {
    %c0_i32 = arith.constant 0 : i32
    %c0_i32_0 = arith.constant 0 : i32
    %c0_i32_1 = arith.constant 0 : i32
    return %arg0, %c0_i32, %c0_i32_0 : i32, i32, i32
  }
  func.func @transform_3(%arg0: i32, %arg1: i32) -> (i32, i32, i32) {
    %c0_i32 = arith.constant 0 : i32
    %c0_i32_0 = arith.constant 0 : i32
    %c0_i32_1 = arith.constant 0 : i32
    return %arg0, %c0_i32, %c0_i32_0 : i32, i32, i32
  }
}

</mosaic_0001>

<bundles_post_ra>
// kernel: _soft_dice_loss_squared_impl.1
= control target key start
LH: loop header
LB: loop body
LE: loop exit
PB: predicated region body
PF: predicated region fallthrough
CT: control target
= control target key end

     0   :  { %s2212_s12 = smov 0   ;;  %s2214_s13 = smov 0   ;;  %s2464_s0 = inlined_call_operand.vmem [shape: f32[2,4,256], index: 0, kind: input, shape index: {}]   ;;  %s2465_s1 = inlined_call_operand.vmem [shape: s8[2,1,256], index: 1, kind: input, shape index: {}]   ;;  %s2466_s2 = inlined_call_operand.vmem [shape: f32[4,4,128], index: 2, kind: output, shape index: {0}]   ;;  %s2467_s3 = inlined_call_operand.vmem [shape: f32[4,4,128], index: 3, kind: output, shape index: {1}]  }
   0x1   :  { %s2216_s14 = smov 0   ;;  %s2218_s15 = smov 0  }
   0x2 LB: > { %s26_s16 = sadd.s32 1, %s2169_s14  ;;  %p2158_p1 = scmp.ne.s32.totalorder %s2161_s12, 0  ;;  %s2173_s15 = sphi %s2218_s15, %s14_s15   ;;  %s2169_s14 = sphi %s2216_s14, %s2486_s14   ;;  %s2165_s13 = sphi %s2214_s13, %s2485_s13   ;;  %s2161_s12 = sphi %s2212_s12, %s2454_s12  }
   0x3   : > { %p28_p0 = scmp.ge.s32.totalorder %s26_s16, 2  ;;  %p47_p2 = scmp.eq.s32.totalorder %s2173_s15, 0 }
   0x4   : > { %p1624_p4 = scmp.ge.s32.totalorder %s2173_s15, 2 }
   0x5   : > { %s2488_s16 = smov (%p28_p0, %s26_s16), 0  ;;  %p2237_p3 = por %p2158_p1, %p47_p2 }
   0x6   : > { %156 = sbr.rel (%p1624_p4) target bundleno = 37 (0x25), region = 16 }
   0xd   : > { %159 = sbr.rel (!%p2237_p3) target bundleno = 30 (0x1e), region = 20  ;;  %s2175_s18 = smov (%p2237_p3), [#allocation2]  }
   0xe   : > { %s2179_s21 = smov (%p2237_p3), %s2464_s0   ;;  %s2183_s22 = smov (%p2237_p3), 0  }
   0xf   : > { %s2187_s23 = smov (%p2237_p3), 0  }
  0x14 LB: >> { %v370_v0 = vld [vmem:[%s2181_s21] sm:$0xff]  ;;  %v372_v1 = vld [vmem:[%s2181_s21 + $0x8] sm:$0xff]  ;;  %s374_s24 = sadd.s32 1, %s2185_s22  ;;  %s364_s23 = sadd.s32 1, %s2189_s23   ;;  %s2189_s23 = sphi %s2187_s23, %s364_s23   ;;  %s2185_s22 = sphi %s2183_s22, %s2184_s22   ;;  %s2181_s21 = sphi %s2179_s21, %s379_s21   ;;  %s2177_s18 = sphi %s2175_s18, %s380_s18  }
  0x15   : >> { %371 = vst [vmem:[%s2177_s18] sm:$0xff] %v370_v0  ;;  %373 = vst [vmem:[%s2177_s18 + $0x14] sm:$0xff] %v372_v1  ;;  %p375_p5 = scmp.ge.s32.totalorder %s374_s24, 1  ;;  %p363_p6 = scmp.ge.s32.totalorder %s364_s23, 1 }
  0x17   : >> { %s2490_s24 = smov (%p375_p5, %s374_s24), 0  ;;  %366 = sbr.rel (!%p363_p6) target bundleno = 20 (0x14), region = 266 }
  0x18   : >> { %s1638_s25 = sshll.u32 %s2490_s24, 3  ;;  %s2184_s22 = smov %s2490_s24  }
  0x19   : >> { %s379_s21 = scalar_lea.vmem %s2464_s0, %s1638_s25   ;;  %s380_s18 = scalar_lea.vmem [#allocation2], %s1638_s25  }
  0x1e PF: > { %584 = sbr.rel (!%p2237_p3) target bundleno = 37 (0x25), region = 86  ;;  %v616_v2 = vld [vmem:[%s2465_s1] sm:$0x3] (%p2237_p3)  ;;  %v618_v3 = vld [vmem:[%s2465_s1 + $0x2] sm:$0x3] (%p2237_p3) }
  0x1f   : > { %617 = vst [vmem:[#allocation3] sm:$0x3] (%p2237_p3), %v616_v2  ;;  %619 = vst [vmem:[#allocation3 + $0x5] sm:$0x3] (%p2237_p3), %v618_v3 }
  0x25 PF: > { %p1673_p7 = scmp.ge.s32.totalorder %s2173_s15, 1  ;;  %p1006_p8 = scmp.lt.s32.totalorder %s2173_s15, 3 }
  0x27   : > { %p1007_p9 = pnand %p1673_p7, %p1006_p8 }
  0x28   : > { %s1674_s5 = sshll.u32 (!%p1007_p9), %s2165_s13, 1  ;;  %s1013_s6 = sand.u32 (!%p1007_p9), 1, %s2161_s12   ;;  %v1084_v4 = vlaneseq (!%p1007_p9)  ;;  %v2191_v16 = vmov (!%p1007_p9), 0.0  }
  0x29   : > { %1010 = sbr.rel (%p1007_p9) target bundleno = 84 (0x54), region = 152  ;;  %p1065_p10 = scmp.lt.s32.totalorder (!%p1007_p9), %s1674_s5, 3 }
  0x2a   : > { %s1701_s7 = smul.u32 (!%p1007_p9), 40, %s1013_s6  ;;  %v1087_v5 = vand.u32 (!%p1007_p9), 127, %v1084_v4  ;;  %v2264_v6 = vshrl.u32 (!%p1007_p9), %v1084_v4, 7 }
  0x2b   : > { %s2262_s8 = smul.u32 (!%p1007_p9), 10, %s1013_s6 }
  0x2c   : > { %v1088_v7 = vadd.s32 (!%p1007_p9), 128, %v1087_v5  ;;  %v1089_v8 = vadd.s32 (!%p1007_p9), 256, %v1087_v5  ;;  %v1090_v9 = vadd.s32 (!%p1007_p9), 384, %v1087_v5  ;;  %v1091_v10 = vadd.s32 (!%p1007_p9), 512, %v1087_v5  ;;  %s1093_s10 = smul.u32 (!%p1007_p9), 640, %s2165_s13  ;;  %s2267_s11 = scalar_lea.vmem (!%p1007_p9), [#allocation2], %s1701_s7 }
  0x2d   : > { %v1094_v11 = vld [vmem:[%s2267_s11] sm:$0xff] (!%p1007_p9)  ;;  %v1095_v12 = vld [vmem:[%s2267_s11 + $0x8] sm:$0xff] (!%p1007_p9)  ;;  %v1097_v13 = vld [vmem:[%s2267_s11 + $0x14] sm:$0xff] (!%p1007_p9)  ;;  %s1022_s13 = scalar_lea.vmem (!%p1007_p9), [#allocation3], %s2262_s8  ;;  %v2291_v20 = vsub.s32 (!%p1007_p9), 0, %v2264_v6  ;;  %v1158_v21 = vsub.s32 (!%p1007_p9), 4, %v2264_v6 }
  0x2e   : > { %v2283_v14 = vld [vmem:[%s2267_s11 + $0x1c] sm:$0xff] (!%p1007_p9)  ;;  %v1126_v15 = vcombine.high (!%p1007_p9), %v1094_v11, %v1094_v11  ;;  %v1101_v17 = vstv (!%p1007_p9), %s1093_s10  ;;  %v1127_v18 = vcombine.high (!%p1007_p9), %v1095_v12, %v1095_v12  ;;  %v1144_v19 = vld [vmem:[%s1022_s13] sm:$0x1f] (!%p1007_p9)  ;;  %v1128_v28 = vcombine.high (!%p1007_p9), %v1097_v13, %v1097_v13  ;;  %v1145_v31 = vld [vmem:[%s1022_s13 + $0x5] sm:$0x1f] (!%p1007_p9) }
  0x2f   : > { %v2298_v22 = vadd.s32 (!%p1007_p9), %v1101_v17, %v1087_v5  ;;  %v2300_v23 = vadd.s32 (!%p1007_p9), %v1101_v17, %v1088_v7  ;;  %v2302_v24 = vadd.s32 (!%p1007_p9), %v1101_v17, %v1089_v8  ;;  %v2304_v25 = vadd.s32 (!%p1007_p9), %v1101_v17, %v1090_v9  ;;  %v1096_v26 = vld [vmem:[%s2267_s11 + $0x10] sm:$0xf] (!%p1007_p9)  ;;  %v1099_v55 = vld [vmem:[%s2267_s11 + $0x24] sm:$0xf] (!%p1007_p9) }
  0x30   : > { %s2492_s5 = smov (!%p1065_p10, %s1674_s5), 3  ;;  %v2307_v27 = vadd.s32 %v1101_v17, %v1091_v10  ;;  %v1129_v29 = vcombine.high %v2283_v14, %v2283_v14  ;;  %v1146_v30 = vunpack.c.0.s8 %v1144_v19  ;;  %v1147_v33 = vunpack.c.1.s8 %v1144_v19 }
  0x31   : > { %s1675_s9 = sshll.u32 %s2492_s5, 2  ;;  %vm2468_vm0 = vcmp.lt.s32.totalorder %v2298_v22, 256  ;;  %vm2469_vm1 = vcmp.lt.s32.totalorder %v2300_v23, 256  ;;  %vm1109_vm2 = vcmp.lt.s32.totalorder %v2302_v24, 256  ;;  %vm1110_vm3 = vcmp.lt.s32.totalorder %v2304_v25, 256 }
  0x32   : > { %s2274_s18 = scalar_lea.vmem %s2466_s2, %s1675_s9  ;;  %s2279_s21 = scalar_lea.vmem %s2467_s3, %s1675_s9  ;;  %vm1111_vm4 = vcmp.lt.s32.totalorder %v2307_v27, 256  ;;  %v1134_v32 = vsel %vm2468_vm0, %v1094_v11, 0.0  ;;  %v1148_v34 = vunpack.c.2.s8 %v1144_v19  ;;  %v1135_v35 = vsel %vm2469_vm1, %v1126_v15, 0.0 }
  0x33   : > { %1080 = vst [vmem:[%s2274_s18] sm:$0xf] %v2191_v16  ;;  %1082 = vst [vmem:[%s2279_s21] sm:$0xf] %v2191_v16  ;;  %v1136_v36 = vsel %vm1109_vm2, %v1095_v12, 0.0  ;;  %v1137_v37 = vsel %vm1110_vm3, %v1127_v18, 0.0  ;;  %v1138_v38 = vsel %vm1111_vm4, %v1096_v26, 0.0  ;;  %v2328_v39 = vsel %vm2468_vm0, %v1097_v13, 0.0 }
  0x34   : > { %1081 = vst [vmem:[%s2274_s18 + $0x4] sm:$0xf] %v2191_v16  ;;  %1083 = vst [vmem:[%s2279_s21 + $0x4] sm:$0xf] %v2191_v16  ;;  %v2332_v40 = vsel %vm2469_vm1, %v1128_v28, 0.0  ;;  %v2337_v41 = vsel %vm1109_vm2, %v2283_v14, 0.0  ;;  %v1149_v42 = vunpack.c.0.s8 %v1145_v31  ;;  %v1150_v43 = vunpack.c.1.s8 %v1145_v31 }
  0x35   : > { %v1151_v44 = vunpack.c.2.s8 %v1145_v31  ;;  %v1155_v45 = vrot.slane %v1146_v30, %v2291_v20  ;;  %v1159_v46 = vrot.slane %v1146_v30, %v1158_v21  ;;  %v1163_v47 = vrot.slane %v1147_v33, %v2291_v20 }
  0x36   : > { %v1167_v48 = vrot.slane %v1147_v33, %v1158_v21  ;;  %v1171_v49 = vrot.slane %v1148_v34, %v2291_v20  ;;  %v1175_v50 = vrot.slane %v1149_v42, %v2291_v20  ;;  %v1179_v51 = vrot.slane %v1149_v42, %v1158_v21 }
  0x37   : > { %v1183_v52 = vrot.slane %v1150_v43, %v2291_v20  ;;  %v1187_v53 = vrot.slane %v1150_v43, %v1158_v21  ;;  %v1191_v54 = vrot.slane %v1151_v44, %v2291_v20  ;;  %v1195_v56 = vrot.slane %v1155_v45, %v2291_v20 }
  0x38   : > { %v1199_v57 = vrot.slane %v1159_v46, %v2291_v20  ;;  %v1203_v58 = vrot.slane %v1163_v47, %v2291_v20  ;;  %v1207_v59 = vrot.slane %v1167_v48, %v2291_v20  ;;  %v1211_v60 = vrot.slane %v1171_v49, %v2291_v20 }
  0x39   : > { %v1215_v61 = vrot.slane %v1175_v50, %v2291_v20  ;;  %v1219_v62 = vrot.slane %v1179_v51, %v2291_v20  ;;  %v1223_v63 = vrot.slane %v1183_v52, %v2291_v20  ;;  %v1227_v0 = vrot.slane %v1187_v53, %v2291_v20 }
  0x3a   : > { %v1231_v1 = vrot.slane %v1191_v54, %v2291_v20  ;;  %vm1232_vm5 = vcmp.eq.s32.totalorder %v1195_v56, %v2264_v6  ;;  %vm1233_vm6 = vcmp.eq.s32.totalorder %v1199_v57, %v2264_v6  ;;  %v1142_v2 = vsel %vm1110_vm3, %v1129_v29, 0.0  ;;  %v1322_v46 = vld [vmem:[%s2274_s18] sm:$0xf] }
  0x3b   : > { %v1143_v3 = vsel %vm1111_vm4, %v1099_v55, 0.0  ;;  %vm1234_vm7 = vcmp.eq.s32.totalorder %v1203_v58, %v2264_v6  ;;  %vm1235_vm8 = vcmp.eq.s32.totalorder %v1207_v59, %v2264_v6  ;;  %vm1242_vm9 = vmand %vm1232_vm5, %vm2468_vm0  ;;  %vm2367_vm10 = vcmp.eq.s32.totalorder %v1211_v60, %v2264_v6  ;;  %v1323_v57 = vld [vmem:[%s2274_s18 + $0x4] sm:$0xf]  ;;  %v1328_v4 = vld [vmem:[%s2279_s21] sm:$0xf] }
  0x3c   : > { %vm2372_vm11 = vcmp.eq.s32.totalorder %v1215_v61, %v2264_v6  ;;  %vm2377_vm12 = vcmp.eq.s32.totalorder %v1219_v62, %v2264_v6  ;;  %vm2382_vm13 = vcmp.eq.s32.totalorder %v1223_v63, %v2264_v6  ;;  %vm1243_vm14 = vmand %vm1233_vm6, %vm2469_vm1  ;;  %vm2389_vm15 = vcmp.eq.s32.totalorder %v1227_v0, %v2264_v6  ;;  %v1329_v7 = vld [vmem:[%s2279_s21 + $0x4] sm:$0xf] }
  0x3d   : > { %vm2394_vm5 = vcmp.eq.s32.totalorder %v1231_v1, %v2264_v6  ;;  %vm1244_vm0 = vmand %vm1234_vm7, %vm1109_vm2  ;;  %v1678_v11 = vsel %vm1242_vm9, 1.0, %v2191_v16  ;;  %v1679_v12 = vsel %vm1243_vm14, 1.0, %v2191_v16  ;;  %v1282_v17 = vmul.f32 %v1134_v32, %v1134_v32 }
  0x3e   : > { %vm1245_vm6 = vmand %vm1235_vm8, %vm1110_vm3  ;;  %v1680_v13 = vsel %vm1244_vm0, 1.0, %v2191_v16  ;;  %v1272_v14 = vmul.f32 %v1678_v11, %v1134_v32  ;;  %v1273_v15 = vmul.f32 %v1679_v12, %v1135_v35  ;;  %v1283_v19 = vmul.f32 %v1135_v35, %v1135_v35 }
  0x3f   : > { %vm1246_vm1 = vmand %vm2367_vm10, %vm1111_vm4  ;;  %v1681_v6 = vsel %vm1245_vm6, 1.0, %v2191_v16  ;;  %v1274_v18 = vmul.f32 %v1680_v13, %v1136_v36  ;;  %v1284_v20 = vmul.f32 %v1136_v36, %v1136_v36  ;;  %vm2483_vm7 = vcmp.lt.s32.totalorder %v2298_v22, 256 }
  0x40   : > { %vm1247_vm8 = vmand %vm2372_vm11, %vm2483_vm7  ;;  %v1682_v21 = vsel %vm1246_vm1, 1.0, %v2191_v16  ;;  %v1275_v26 = vmul.f32 %v1681_v6, %v1137_v37  ;;  %v1306_v28 = vadd.f32 %v1273_v15, %v1272_v14  ;;  %v1285_v29 = vmul.f32 %v1137_v37, %v1137_v37 }
  0x41   : > { %vm2484_vm0 = vcmp.lt.s32.totalorder %v2300_v23, 256  ;;  %v1683_v30 = vsel %vm1247_vm8, 1.0, %v2191_v16  ;;  %v1276_v31 = vmul.f32 %v1682_v21, %v1138_v38  ;;  %v1286_v32 = vmul.f32 %v1138_v38, %v1138_v38  ;;  %vm1249_vm1 = vmand %vm2382_vm13, %vm1109_vm2 }
  0x42   : > { %vm1248_vm9 = vmand %vm2377_vm12, %vm2484_vm0  ;;  %v1287_v22 = vmul.f32 %v2328_v39, %v2328_v39  ;;  %v1277_v34 = vmul.f32 %v1683_v30, %v2328_v39  ;;  %v1310_v23 = vadd.f32 %v1306_v28, %v1274_v18  ;;  %v1288_v35 = vmul.f32 %v2332_v40, %v2332_v40 }
  0x43   : > { %v1684_v33 = vsel %vm1248_vm9, 1.0, %v2191_v16  ;;  %vm1250_vm10 = vmand %vm2389_vm15, %vm1110_vm3  ;;  %v1685_v36 = vsel %vm1249_vm1, 1.0, %v2191_v16  ;;  %v1289_v37 = vmul.f32 %v2337_v41, %v2337_v41  ;;  %v1292_v38 = vadd.f32 %v1678_v11, %v1282_v17 }
  0x44   : > { %v1278_v24 = vmul.f32 %v1684_v33, %v2332_v40  ;;  %vm1251_vm2 = vmand %vm2394_vm5, %vm1111_vm4  ;;  %v1686_v39 = vsel %vm1250_vm10, 1.0, %v2191_v16  ;;  %v1279_v25 = vmul.f32 %v1685_v36, %v2337_v41  ;;  %v1314_v42 = vadd.f32 %v1310_v23, %v1275_v26 }
  0x45   : > { %v1293_v43 = vadd.f32 %v1679_v12, %v1283_v19  ;;  %v1687_v44 = vsel %vm1251_vm2, 1.0, %v2191_v16  ;;  %v1280_v45 = vmul.f32 %v1686_v39, %v1142_v2  ;;  %v1290_v47 = vmul.f32 %v1142_v2, %v1142_v2 }
  0x46   : > { %v1307_v40 = vadd.f32 %v1278_v24, %v1277_v34  ;;  %v1281_v48 = vmul.f32 %v1687_v44, %v1143_v3  ;;  %v1318_v49 = vadd.f32 %v1314_v42, %v1276_v31  ;;  %v1291_v27 = vmul.f32 %v1143_v3, %v1143_v3 }
  0x47   : > { %v1294_v50 = vadd.f32 %v1680_v13, %v1284_v20  ;;  %v1297_v52 = vadd.f32 %v1683_v30, %v1287_v22  ;;  %v1298_v53 = vadd.f32 %v1684_v33, %v1288_v35  ;;  %v1299_v54 = vadd.f32 %v1685_v36, %v1289_v37 }
  0x48   : > { %v1311_v51 = vadd.f32 %v1307_v40, %v1279_v25  ;;  %v1324_v55 = vadd.f32 %v1322_v46, %v1318_v49  ;;  %v1295_v41 = vadd.f32 %v1681_v6, %v1285_v29  ;;  %v1308_v56 = vadd.f32 %v1293_v43, %v1292_v38 }
  0x49   : > { %v1300_v58 = vadd.f32 %v1686_v39, %v1290_v47  ;;  %v1309_v59 = vadd.f32 %v1298_v53, %v1297_v52  ;;  %v1296_v60 = vadd.f32 %v1682_v21, %v1286_v32  ;;  %v1301_v63 = vadd.f32 %v1687_v44, %v1291_v27 }
  0x4a   : > { %v1315_v16 = vadd.f32 %v1311_v51, %v1280_v45  ;;  %1326 = vst [vmem:[%s2274_s18] sm:$0xf] %v1324_v55  ;;  %v1312_v61 = vadd.f32 %v1308_v56, %v1294_v50 }
  0x4b   : > { %v1313_v0 = vadd.f32 %v1309_v59, %v1299_v54 }
  0x4c   : > { %v1319_v62 = vadd.f32 %v1315_v16, %v1281_v48  ;;  %v1316_v1 = vadd.f32 %v1312_v61, %v1295_v41 }
  0x4d   : > { %v1317_v3 = vadd.f32 %v1313_v0, %v1300_v58 }
  0x4e   : > { %v1325_v2 = vadd.f32 %v1323_v57, %v1319_v62  ;;  %v1320_v5 = vadd.f32 %v1316_v1, %v1296_v60 }
  0x4f   : > { %v1321_v8 = vadd.f32 %v1317_v3, %v1301_v63 }
  0x50   : > { %1327 = vst [vmem:[%s2274_s18 + $0x4] sm:$0xf] %v1325_v2  ;;  %v1330_v9 = vadd.f32 %v1328_v4, %v1320_v5 }
  0x51   : > { %v1331_v10 = vadd.f32 %v1329_v7, %v1321_v8 }
  0x52   : > { %1332 = vst [vmem:[%s2279_s21] sm:$0xf] %v1330_v9 }
  0x53   : > { %1333 = vst [vmem:[%s2279_s21 + $0x4] sm:$0xf] %v1331_v10 }
  0x54 PF: > { %s14_s15 = sadd.s32 1, %s2173_s15   ;;  %s2454_s12 = smov 0  }
  0x55   : > { %p11_p11 = scmp.ge.s32.totalorder %s14_s15, 4   ;;  %s2485_s13 = smov %s2169_s14 }
  0x56   : > { %s2486_s14 = smov %s2488_s16 }
  0x57   :  { %13 = sbr.rel (!%p11_p11) target bundleno = 2 (0x2), region = 343 }

</bundles_post_ra>
